<compile_context>
chip_gen: v6e
topology: v6e:2x2x1
jax: 0.10.0
libtpu: 0.0.40
codegen_flags: <defaults>
</compile_context>

<pallas_src>
import functools

import jax
import jax.numpy as jnp
from jax import lax
from jax.experimental import pallas as pl
from jax.experimental.pallas import tpu as pltpu

EPS = 1e-5
NEG_SLOPE = 0.01
LANE = 128          # feature dims padded per-layer to a multiple of 128 lanes
SUBLANE_BF16 = 16   # bf16 LHS: 16 rows per packed sublane group


def _round_up(x, m):
    return (x + m - 1) // m * m


def _vmem_limit_bytes():
    """min(100 MiB, 3/4 of physical VMEM): ~96-100 MiB on v5e/v6e, ~48 MiB on v7x."""
    try:
        cap = int(pltpu.get_tpu_info().vmem_capacity_bytes)
    except Exception:
        cap = 64 * 1024 * 1024
    return min(100 * 1024 * 1024, (cap * 3) // 4)


def _pick_tile(dout_pad, cap=512):
    """Largest multiple of 128 that divides dout_pad and is <= cap."""
    tn = min(cap, dout_pad)
    while dout_pad % tn:
        tn -= LANE
    return tn


# ----------------------------------------------------------------------------
# Fused whole-network kernel (small/medium widths): activation never leaves
# VMEM/vregs, one kernel launch for the whole MLP.
# ----------------------------------------------------------------------------
def _fused_mlp_kernel(*refs, has_bn, b_real):
    """refs = [x, (per-layer params...), out].

    Per BN layer the params are (w_bf16, gamma, beta); per non-BN layer (w_bf16, bias).
    x: (B_pad, Din0_pad) bf16, zero-padded. out: (B_pad, DoutL_pad) f32.
    """
    x_ref = refs[0]
    o_ref = refs[-1]
    params = refs[1:-1]
    n_layers = len(has_bn)

    b_pad = x_ref.shape[0]
    row = lax.broadcasted_iota(jnp.int32, (b_pad, 1), 0)
    valid = (row < b_real).astype(jnp.float32)   # re-zero padded batch rows post-BN
    inv_b = 1.0 / float(b_real)

    h = x_ref[...]                               # bf16 activation carried layer-to-layer
    p = 0
    for l, bn in enumerate(has_bn):              # static unroll: L is small & known
        last = (l == n_layers - 1)
        w_ref = params[p]; p += 1
        y = jnp.dot(h, w_ref[...], preferred_element_type=jnp.float32)
        if bn:
            g_ref = params[p]; bt_ref = params[p + 1]; p += 2
            # Training-mode BatchNorm1d, biased variance, single pass.
            # No bias add (it cancels exactly) and no batch masking: padded rows
            # of y are exactly zero, so they contribute nothing to s1/s2.
            s1 = jnp.sum(y, axis=0, keepdims=True)
            s2 = jnp.sum(y * y, axis=0, keepdims=True)
            mean = s1 * inv_b
            var = jnp.maximum(s2 * inv_b - mean * mean, 0.0)
            y = (y - mean) * lax.rsqrt(var + EPS) * g_ref[...] + bt_ref[...]
            y = jnp.where(y >= 0, y, NEG_SLOPE * y)      # LeakyReLU(0.01)
            y = y * valid                                # keep padded rows at 0
        else:
            b_ref = params[p]; p += 1
            y = y + b_ref[...]
        h = y if last else y.astype(jnp.bfloat16)        # bf16 carry between layers
    o_ref[...] = h.astype(o_ref.dtype)


# ----------------------------------------------------------------------------
# Per-layer kernel gridded over the OUTPUT-feature axis (large widths).
# BN statistics are per-feature, so feature tiling is exact; the grid axis is
# "parallel" (megacore on v7x) and weight tiles stream from HBM double-buffered.
# ----------------------------------------------------------------------------
def _layer_kernel(x_ref, w_ref, p1_ref, p2_ref, o_ref, *, has_bn, b_real):
    y = jnp.dot(x_ref[...], w_ref[...], preferred_element_type=jnp.float32)
    if has_bn:
        inv_b = 1.0 / float(b_real)
        s1 = jnp.sum(y, axis=0, keepdims=True)
        s2 = jnp.sum(y * y, axis=0, keepdims=True)
        mean = s1 * inv_b
        var = jnp.maximum(s2 * inv_b - mean * mean, 0.0)
        y = (y - mean) * lax.rsqrt(var + EPS) * p1_ref[...] + p2_ref[...]
        y = jnp.where(y >= 0, y, NEG_SLOPE * y)
        row = lax.broadcasted_iota(jnp.int32, (y.shape[0], 1), 0)
        y = y * (row < b_real).astype(jnp.float32)
    else:
        y = y + p1_ref[...]        # p2_ref unused for non-BN layers
    o_ref[...] = y.astype(o_ref.dtype)


class MLP:
    """JAX/Pallas port of the PyTorch MLP module (training-mode forward)."""

    def __init__(self, hidden_size, last_activation=True, key=None):
        self.hidden_size = tuple(hidden_size)
        self.last_activation = last_activation
        if key is None:
            key = jax.random.PRNGKey(0)

        n_layers = len(hidden_size) - 1
        self.layers = []        # padded, kernel-ready params
        self.layers_real = []   # unpadded f32 params (for the pure-JAX references)

        for i in range(n_layers):
            in_dim, out_dim = hidden_size[i], hidden_size[i + 1]
            din_pad, dout_pad = _round_up(in_dim, LANE), _round_up(out_dim, LANE)
            key, kw, kb, kg, kbeta = jax.random.split(key, 5)
            bound = 1.0 / (in_dim ** 0.5)
            # nn.Linear-style uniform init; weight kept transposed as (Din, Dout).
            w = jax.random.uniform(kw, (in_dim, out_dim), jnp.float32, -bound, bound)
            b = jax.random.uniform(kb, (1, out_dim), jnp.float32, -bound, bound)
            has_bn = (i < n_layers - 1) or (i == n_layers - 1 and last_activation)
            if has_bn:
                # Non-trivial BN affine params so the affine path is exercised
                # (PyTorch default is gamma=1, beta=0; ops/semantics identical).
                gamma = 1.0 + 0.1 * jax.random.normal(kg, (1, out_dim), jnp.float32)
                beta = 0.1 * jax.random.normal(kbeta, (1, out_dim), jnp.float32)
            else:
                gamma = jnp.ones((1, out_dim), jnp.float32)
                beta = jnp.zeros((1, out_dim), jnp.float32)
            self.layers_real.append((w, b, gamma, beta, has_bn))

            # Per-layer zero-padded, lane-dense layout; weights pre-cast to bf16.
            w_pad = (jnp.zeros((din_pad, dout_pad), jnp.float32)
                     .at[:in_dim, :out_dim].set(w)).astype(jnp.bfloat16)
            if has_bn:
                p1 = jnp.ones((1, dout_pad), jnp.float32).at[:, :out_dim].set(gamma)
                p2 = jnp.zeros((1, dout_pad), jnp.float32).at[:, :out_dim].set(beta)
            else:
                p1 = jnp.zeros((1, dout_pad), jnp.float32).at[:, :out_dim].set(b)
                p2 = jnp.zeros((1, dout_pad), jnp.float32)   # unused placeholder
            self.layers.append(dict(w=w_pad, p1=p1, p2=p2, bn=has_bn,
                                    din_pad=din_pad, dout_pad=dout_pad))

    # -- fused path --------------------------------------------------------
    def _forward_fused(self, x_pad, b_real):
        flat_params, has_bn = [], []
        for lyr in self.layers:
            flat_params.append(lyr["w"])
            flat_params.append(lyr["p1"])
            if lyr["bn"]:
                flat_params.append(lyr["p2"])
            has_bn.append(lyr["bn"])
        kernel = functools.partial(_fused_mlp_kernel,
                                   has_bn=tuple(has_bn), b_real=int(b_real))
        vmem = pl.BlockSpec(memory_space=pltpu.MemorySpace.VMEM)
        out_dpad = self.layers[-1]["dout_pad"]
        return pl.pallas_call(
            kernel,
            out_shape=jax.ShapeDtypeStruct((x_pad.shape[0], out_dpad), jnp.float32),
            in_specs=[vmem] * (1 + len(flat_params)),
            out_specs=vmem,
            compiler_params=pltpu.CompilerParams(
                vmem_limit_bytes=_vmem_limit_bytes()),
        )(x_pad, *flat_params)

    # -- per-layer feature-tiled path (large widths) -----------------------
    def _forward_tiled(self, x_pad, b_real):
        h = x_pad
        n = len(self.layers)
        for l, lyr in enumerate(self.layers):
            last = (l == n - 1)
            b_pad, din_pad = h.shape
            dout_pad = lyr["dout_pad"]
            tn = _pick_tile(dout_pad)
            kernel = functools.partial(_layer_kernel,
                                       has_bn=lyr["bn"], b_real=int(b_real))
            h = pl.pallas_call(
                kernel,
                out_shape=jax.ShapeDtypeStruct(
                    (b_pad, dout_pad), jnp.float32 if last else jnp.bfloat16),
                grid=(dout_pad // tn,),
                in_specs=[
                    pl.BlockSpec((b_pad, din_pad), lambda j: (0, 0)),
                    pl.BlockSpec((din_pad, tn), lambda j: (0, j)),
                    pl.BlockSpec((1, tn), lambda j: (0, j)),
                    pl.BlockSpec((1, tn), lambda j: (0, j)),
                ],
                out_specs=pl.BlockSpec((b_pad, tn), lambda j: (0, j)),
                compiler_params=pltpu.CompilerParams(
                    dimension_semantics=("parallel",),
                    vmem_limit_bytes=_vmem_limit_bytes()),
            )(h, lyr["w"], lyr["p1"], lyr["p2"])
        return h

    def _fused_vmem_estimate(self, b_pad):
        byt = 0
        for lyr in self.layers:
            byt += lyr["w"].size * 2 + (lyr["p1"].size + lyr["p2"].size) * 4
        max_d = max([self.layers[0]["din_pad"]] + [l["dout_pad"] for l in self.layers])
        byt += 4 * b_pad * max_d * 4      # rough activation / working-set bound
        return byt

    def __call__(self, x, force_tiled=False):
        b, d_in = x.shape
        assert d_in == self.hidden_size[0]
        b_pad = _round_up(max(b, 1), SUBLANE_BF16)
        din_pad0 = self.layers[0]["din_pad"]
        x_pad = (jnp.zeros((b_pad, din_pad0), jnp.bfloat16)
                 .at[:b, :d_in].set(x.astype(jnp.bfloat16)))
        use_tiled = force_tiled or (
            self._fused_vmem_estimate(b_pad) > _vmem_limit_bytes() // 2)
        out = self._forward_tiled(x_pad, b) if use_tiled else self._forward_fused(x_pad, b)
        return out[:b, :self.hidden_size[-1]]


# ----------------------------------------------------------------------------
# References
# ----------------------------------------------------------------------------
def _reference_matched(mlp, x):
    """Pure-JAX reference mirroring the kernel numerics exactly
    (bf16 MXU inputs, f32 accumulation, no pre-BN bias, one-pass biased var,
    bf16 inter-layer activations)."""
    b = x.shape[0]
    inv_b = 1.0 / float(b)
    n = len(mlp.layers_real)
    h = x.astype(jnp.bfloat16)
    for l, (w, bias, gamma, beta, has_bn) in enumerate(mlp.layers_real):
        y = jnp.dot(h, w.astype(jnp.bfloat16), preferred_element_type=jnp.float32)
        if has_bn:
            s1 = jnp.sum(y, axis=0, keepdims=True)
            s2 = jnp.sum(y * y, axis=0, keepdims=True)
            mean = s1 * inv_b
            var = jnp.maximum(s2 * inv_b - mean * mean, 0.0)
            y = (y - mean) * lax.rsqrt(var + EPS) * gamma + beta
            y = jnp.where(y >= 0, y, NEG_SLOPE * y)
        else:
            y = y + bias
        h = y if l == n - 1 else y.astype(jnp.bfloat16)
    return h


def _reference_f32(mlp, x):
    """Pure-f32 reference matching the original PyTorch training-mode forward."""
    # TODO(synk): BatchNorm1d running_mean/running_var tracking is omitted
    # (it does not affect the training-mode forward value).
    h = x
    for (w, bias, gamma, beta, has_bn) in mlp.layers_real:
        y = h @ w + bias
        if has_bn:
            mean = jnp.mean(y, axis=0, keepdims=True)
            var = jnp.mean((y - mean) ** 2, axis=0, keepdims=True)
            y = (y - mean) * lax.rsqrt(var + EPS) * gamma + beta
            y = jnp.where(y >= 0, y, NEG_SLOPE * y)
        h = y
    return h


if __name__ == "__main__":
    key = jax.random.PRNGKey(0)
    kx1, kp1, kx2, kp2 = jax.random.split(key, 4)

    # Case 1: tiny widths -> fused single-kernel path, last_activation=True.
    batch1, hidden1 = 8, (16, 32, 8)
    x1 = jax.random.normal(kx1, (batch1, hidden1[0]), jnp.float32)
    mlp1 = MLP(hidden1, last_activation=True, key=kp1)
    out1 = jax.block_until_ready(mlp1(x1))
    assert out1.shape == (batch1, hidden1[-1])
    ref1 = _reference_matched(mlp1, x1)
    assert jnp.allclose(out1, ref1, atol=2e-4, rtol=2e-4), "fused: mismatch vs matched ref"
    ref1_32 = _reference_f32(mlp1, x1)
    assert jnp.allclose(out1, ref1_32, atol=2.5e-1, rtol=2.5e-1), "fused: drift vs f32 ref"

    # Case 2: per-layer output-feature-tiled path (forced), last_activation=False,
    # batch 12 (pads to 16), middle width 256 (grid of 2 feature tiles).
    batch2, hidden2 = 12, (16, 256, 8)
    x2 = jax.random.normal(kx2, (batch2, hidden2[0]), jnp.float32)
    mlp2 = MLP(hidden2, last_activation=False, key=kp2)
    out2 = jax.block_until_ready(mlp2(x2, force_tiled=True))
    assert out2.shape == (batch2, hidden2[-1])
    ref2 = _reference_matched(mlp2, x2)
    assert jnp.allclose(out2, ref2, atol=2e-4, rtol=2e-4), "tiled: mismatch vs matched ref"
    ref2_32 = _reference_f32(mlp2, x2)
    assert jnp.allclose(out2, ref2_32, atol=2.5e-1, rtol=2.5e-1), "tiled: drift vs f32 ref"

    print("KERNEL_OK")
</pallas_src>

<mosaic_0001>
module attributes {stable_mosaic.version = 11 : i64} {
  func.func @_fused_mlp_kernel(%arg0: memref<16x128xbf16, #tpu.memory_space<vmem>>, %arg1: memref<128x128xbf16, #tpu.memory_space<vmem>>, %arg2: memref<1x128xf32, #tpu.memory_space<vmem>>, %arg3: memref<1x128xf32, #tpu.memory_space<vmem>>, %arg4: memref<128x128xbf16, #tpu.memory_space<vmem>>, %arg5: memref<1x128xf32, #tpu.memory_space<vmem>>, %arg6: memref<1x128xf32, #tpu.memory_space<vmem>>, %arg7: memref<16x128xf32, #tpu.memory_space<vmem>>) attributes {dimension_semantics = [], scalar_prefetch = 0 : i64, scratch_operands = 0 : i64, tpu.core_type = #tpu.core_type<tc>} {
    %0 = tpu.iota {dimensions = array<i32: 0>} : vector<16x1xi32>
    %c8_i32 = arith.constant 8 : i32
    %1 = vector.broadcast %c8_i32 : i32 to vector<16x1xi32>
    %2 = arith.cmpi slt, %0, %1 : vector<16x1xi32>
    %3 = arith.extui %2 : vector<16x1xi1> to vector<16x1xi32>
    %4 = arith.sitofp %3 : vector<16x1xi32> to vector<16x1xf32>
    %c0 = arith.constant 0 : index
    %c0_0 = arith.constant 0 : index
    %5 = vector.load %arg0[%c0, %c0_0] : memref<16x128xbf16, #tpu.memory_space<vmem>>, vector<16x128xbf16>
    %c0_1 = arith.constant 0 : index
    %c0_2 = arith.constant 0 : index
    %6 = vector.load %arg1[%c0_1, %c0_2] : memref<128x128xbf16, #tpu.memory_space<vmem>>, vector<128x128xbf16>
    %cst = arith.constant dense<0.000000e+00> : vector<16x128xf32>
    %7 = tpu.matmul %5, %6, %cst {dimension_numbers = #tpu.dot_dimension_numbers<[1], [0], [0], [1], [0, 0, 1, 1], [], []>} : vector<16x128xbf16>, vector<128x128xbf16>, vector<16x128xf32> -> vector<16x128xf32>
    %cst_3 = arith.constant dense<0.000000e+00> : vector<128xf32>
    %8 = vector.multi_reduction <add>, %7, %cst_3 [0] : vector<16x128xf32> to vector<128xf32>
    %9 = vector.shape_cast %8 : vector<128xf32> to vector<1x128xf32>
    %10 = arith.mulf %7, %7 : vector<16x128xf32>
    %cst_4 = arith.constant dense<0.000000e+00> : vector<128xf32>
    %11 = vector.multi_reduction <add>, %10, %cst_4 [0] : vector<16x128xf32> to vector<128xf32>
    %12 = vector.shape_cast %11 : vector<128xf32> to vector<1x128xf32>
    %cst_5 = arith.constant 1.250000e-01 : f32
    %13 = vector.broadcast %cst_5 : f32 to vector<1x128xf32>
    %14 = arith.mulf %9, %13 : vector<1x128xf32>
    %cst_6 = arith.constant 1.250000e-01 : f32
    %15 = vector.broadcast %cst_6 : f32 to vector<1x128xf32>
    %16 = arith.mulf %12, %15 : vector<1x128xf32>
    %17 = arith.mulf %14, %14 : vector<1x128xf32>
    %18 = arith.subf %16, %17 : vector<1x128xf32>
    %cst_7 = arith.constant 0.000000e+00 : f32
    %19 = vector.broadcast %cst_7 : f32 to vector<1x128xf32>
    %20 = arith.maximumf %18, %19 : vector<1x128xf32>
    %21 = vector.broadcast %14 : vector<1x128xf32> to vector<16x128xf32>
    %22 = arith.subf %7, %21 : vector<16x128xf32>
    %cst_8 = arith.constant 9.99999974E-6 : f32
    %23 = vector.broadcast %cst_8 : f32 to vector<1x128xf32>
    %24 = arith.addf %20, %23 : vector<1x128xf32>
    %25 = math.rsqrt %24 : vector<1x128xf32>
    %26 = vector.broadcast %25 : vector<1x128xf32> to vector<16x128xf32>
    %27 = arith.mulf %22, %26 : vector<16x128xf32>
    %c0_9 = arith.constant 0 : index
    %c0_10 = arith.constant 0 : index
    %28 = vector.load %arg2[%c0_9, %c0_10] : memref<1x128xf32, #tpu.memory_space<vmem>>, vector<1x128xf32>
    %29 = vector.broadcast %28 : vector<1x128xf32> to vector<16x128xf32>
    %30 = arith.mulf %27, %29 : vector<16x128xf32>
    %c0_11 = arith.constant 0 : index
    %c0_12 = arith.constant 0 : index
    %31 = vector.load %arg3[%c0_11, %c0_12] : memref<1x128xf32, #tpu.memory_space<vmem>>, vector<1x128xf32>
    %32 = vector.broadcast %31 : vector<1x128xf32> to vector<16x128xf32>
    %33 = arith.addf %30, %32 : vector<16x128xf32>
    %cst_13 = arith.constant 0.000000e+00 : f32
    %34 = vector.broadcast %cst_13 : f32 to vector<16x128xf32>
    %35 = arith.cmpf oge, %33, %34 : vector<16x128xf32>
    %cst_14 = arith.constant 0.00999999977 : f32
    %36 = vector.broadcast %cst_14 : f32 to vector<16x128xf32>
    %37 = arith.mulf %36, %33 : vector<16x128xf32>
    %38 = arith.select %35, %33, %37 : vector<16x128xi1>, vector<16x128xf32>
    %39 = vector.broadcast %4 : vector<16x1xf32> to vector<16x128xf32>
    %40 = arith.mulf %38, %39 : vector<16x128xf32>
    %41 = arith.truncf %40 : vector<16x128xf32> to vector<16x128xbf16>
    %c0_15 = arith.constant 0 : index
    %c0_16 = arith.constant 0 : index
    %42 = vector.load %arg4[%c0_15, %c0_16] : memref<128x128xbf16, #tpu.memory_space<vmem>>, vector<128x128xbf16>
    %cst_17 = arith.constant dense<0.000000e+00> : vector<16x128xf32>
    %43 = tpu.matmul %41, %42, %cst_17 {dimension_numbers = #tpu.dot_dimension_numbers<[1], [0], [0], [1], [0, 0, 1, 1], [], []>} : vector<16x128xbf16>, vector<128x128xbf16>, vector<16x128xf32> -> vector<16x128xf32>
    %cst_18 = arith.constant dense<0.000000e+00> : vector<128xf32>
    %44 = vector.multi_reduction <add>, %43, %cst_18 [0] : vector<16x128xf32> to vector<128xf32>
    %45 = vector.shape_cast %44 : vector<128xf32> to vector<1x128xf32>
    %46 = arith.mulf %43, %43 : vector<16x128xf32>
    %cst_19 = arith.constant dense<0.000000e+00> : vector<128xf32>
    %47 = vector.multi_reduction <add>, %46, %cst_19 [0] : vector<16x128xf32> to vector<128xf32>
    %48 = vector.shape_cast %47 : vector<128xf32> to vector<1x128xf32>
    %cst_20 = arith.constant 1.250000e-01 : f32
    %49 = vector.broadcast %cst_20 : f32 to vector<1x128xf32>
    %50 = arith.mulf %45, %49 : vector<1x128xf32>
    %cst_21 = arith.constant 1.250000e-01 : f32
    %51 = vector.broadcast %cst_21 : f32 to vector<1x128xf32>
    %52 = arith.mulf %48, %51 : vector<1x128xf32>
    %53 = arith.mulf %50, %50 : vector<1x128xf32>
    %54 = arith.subf %52, %53 : vector<1x128xf32>
    %cst_22 = arith.constant 0.000000e+00 : f32
    %55 = vector.broadcast %cst_22 : f32 to vector<1x128xf32>
    %56 = arith.maximumf %54, %55 : vector<1x128xf32>
    %57 = vector.broadcast %50 : vector<1x128xf32> to vector<16x128xf32>
    %58 = arith.subf %43, %57 : vector<16x128xf32>
    %cst_23 = arith.constant 9.99999974E-6 : f32
    %59 = vector.broadcast %cst_23 : f32 to vector<1x128xf32>
    %60 = arith.addf %56, %59 : vector<1x128xf32>
    %61 = math.rsqrt %60 : vector<1x128xf32>
    %62 = vector.broadcast %61 : vector<1x128xf32> to vector<16x128xf32>
    %63 = arith.mulf %58, %62 : vector<16x128xf32>
    %c0_24 = arith.constant 0 : index
    %c0_25 = arith.constant 0 : index
    %64 = vector.load %arg5[%c0_24, %c0_25] : memref<1x128xf32, #tpu.memory_space<vmem>>, vector<1x128xf32>
    %65 = vector.broadcast %64 : vector<1x128xf32> to vector<16x128xf32>
    %66 = arith.mulf %63, %65 : vector<16x128xf32>
    %c0_26 = arith.constant 0 : index
    %c0_27 = arith.constant 0 : index
    %67 = vector.load %arg6[%c0_26, %c0_27] : memref<1x128xf32, #tpu.memory_space<vmem>>, vector<1x128xf32>
    %68 = vector.broadcast %67 : vector<1x128xf32> to vector<16x128xf32>
    %69 = arith.addf %66, %68 : vector<16x128xf32>
    %cst_28 = arith.constant 0.000000e+00 : f32
    %70 = vector.broadcast %cst_28 : f32 to vector<16x128xf32>
    %71 = arith.cmpf oge, %69, %70 : vector<16x128xf32>
    %cst_29 = arith.constant 0.00999999977 : f32
    %72 = vector.broadcast %cst_29 : f32 to vector<16x128xf32>
    %73 = arith.mulf %72, %69 : vector<16x128xf32>
    %74 = arith.select %71, %69, %73 : vector<16x128xi1>, vector<16x128xf32>
    %75 = vector.broadcast %4 : vector<16x1xf32> to vector<16x128xf32>
    %76 = arith.mulf %74, %75 : vector<16x128xf32>
    %c0_30 = arith.constant 0 : index
    %c0_31 = arith.constant 0 : index
    %77 = vector.load %arg7[%c0_30, %c0_31] : memref<16x128xf32, #tpu.memory_space<vmem>>, vector<16x128xf32>
    tpu.vector_store %arg7[%c0_30, %c0_31], %76 {strides = array<i32>} : memref<16x128xf32, #tpu.memory_space<vmem>>, vector<16x128xf32>,
    return
  }
}

</mosaic_0001>

<bundles_post_ra>
// kernel: tpu_custom_call.1
= control target key start
LH: loop header
LB: loop body
LE: loop exit
PB: predicated region body
PF: predicated region fallthrough
CT: control target
= control target key end

     0   :  { %12 = vsyncpa [#allocation3], 0  ;;  %s693_s0 = inlined_call_operand.hbm [shape: bf16[16,128], index: 0, kind: input, shape index: {}]   ;;  %s694_s1 = inlined_call_operand.hbm [shape: bf16[128,128], index: 1, kind: input, shape index: {}]   ;;  %s695_s2 = inlined_call_operand.vmem [shape: f32[1,128], index: 2, kind: input, shape index: {}]   ;;  %s696_s3 = inlined_call_operand.vmem [shape: f32[1,128], index: 3, kind: input, shape index: {}]   ;;  %s697_s4 = inlined_call_operand.hbm [shape: bf16[128,128], index: 4, kind: input, shape index: {}]   ;;  %s698_s5 = inlined_call_operand.vmem [shape: f32[1,128], index: 5, kind: input, shape index: {}]   ;;  %s699_s6 = inlined_call_operand.vmem [shape: f32[1,128], index: 6, kind: input, shape index: {}]   ;;  %s700_s7 = inlined_call_operand.hbm [shape: f32[16,128], index: 7, kind: output, shape index: {}]  }
   0x1   :  { %13 = vsyncpa [#allocation6], 0 }
   0x2   :  { %14 = vsyncpa [#allocation4], 0  ;;  %s619_s24 = smov [#allocation5]   ;;  %s620_s26 = smov [#allocation2]  }
   0x3   :  { %s32_s25 = sshll.u32 %s619_s24, 4  ;;  %s20_s27 = sshll.u32 %s620_s26, 4  ;;  %s33_s25 = int_to_ptr.vmem [resolvable:$true] %s32_s25  ;;  %s21_s27 = int_to_ptr.vmem [resolvable:$true] %s20_s27 }
   0x4   :  { %s541_s28 = scalar_lea.vmem %s33_s25, 1024  ;;  %p546_p1 = scmp.lt.s32.totalorder %s33_s25, %s33_s25 }
   0x5   :  { %p542_p0 = scmp.ne.s32.totalorder %s33_s25, %s541_s28  ;;  %p547_p2 = scmp.lt.s32.totalorder %s541_s28, %s541_s28 }
   0x7   :  { %p548_p3 = por %p547_p2, %p546_p1 }
   0x9   :  { %p549_p4 = pnand %p548_p3, %p542_p0 }
   0xb   :  { %552 = shalt.err (!%p549_p4)
}
   0xc   :  { %s621_s29 = smov 64   ;;  %s622_s30 = smov 4  }
   0xd   :  { %38 = dma.hbm_to_vmem [thread:$0]  %s694_s1, 1024, %s33_s25, [#allocation6], %s621_s29, %s621_s29, %s622_s30  }
   0xe   :  { %s561_s10 = scalar_lea.vmem %s21_s27, 128  ;;  %p566_p6 = scmp.lt.s32.totalorder %s21_s27, %s21_s27 }
   0xf   :  { %p562_p5 = scmp.ne.s32.totalorder %s21_s27, %s561_s10  ;;  %p567_p7 = scmp.lt.s32.totalorder %s561_s10, %s561_s10 }
  0x11   :  { %p568_p8 = por %p567_p7, %p566_p6 }
  0x13   :  { %p569_p9 = pnand %p568_p8, %p562_p5 }
  0x15   :  { %572 = shalt.err (!%p569_p9)
}
  0x16   :  { %26 = dma.hbm_to_vmem [thread:$0]  %s693_s0, 128, %s21_s27, [#allocation3], %s621_s29, %s621_s29, %s622_s30  }
  0x17   :  { %s623_s13 = smov [#allocation7]  }
  0x18   :  { %s48_s14 = sshll.u32 %s623_s13, 4  ;;  %s49_s14 = int_to_ptr.vmem [resolvable:$true] %s48_s14 }
  0x19   :  { %s581_s15 = scalar_lea.vmem %s49_s14, 1024  ;;  %p586_p11 = scmp.lt.s32.totalorder %s49_s14, %s49_s14 }
  0x1a   :  { %p582_p10 = scmp.ne.s32.totalorder %s49_s14, %s581_s15  ;;  %p587_p12 = scmp.lt.s32.totalorder %s581_s15, %s581_s15 }
  0x1c   :  { %p588_p13 = por %p587_p12, %p586_p11 }
  0x1e   :  { %p589_p0 = pnand %p588_p13, %p582_p10 }
  0x20   :  { %592 = shalt.err (!%p589_p0)
}
  0x21   :  { %54 = dma.hbm_to_vmem [thread:$0]  %s697_s4, 1024, %s49_s14, [#allocation6], %s621_s29, %s621_s29, %s622_s30  }
  0x22   :  { %613 = dma.done.wait [#allocation3], 128  }
  0x23   :  { %614 = vsyncadd [#allocation3], 4294967168 }
  0x24   :  { %615 = dma.done.wait [#allocation6], 2048  }
  0x25   :  { %616 = vsyncadd [#allocation6], 4294965248  ;;  %v624_v0 = vmov 0.0   ;;  %vm625_vm0 = vmmov 0   ;;  %v512_v1 = vld [vmem:[#allocation5 + $0x38] sm:$0xff]   ;;  %v513_v2 = vld [vmem:[#allocation5 + $0x30] sm:$0xff]  }
  0x26   :  { %462 = vmatprep.subr.bf16.mxu0 %v624_v0  ;;  %478 = vmatprep.mubr.msk.bf16.mxu0 %vm625_vm0, %v624_v0  ;;  %v514_v3 = vld [vmem:[#allocation5 + $0x28] sm:$0xff]   ;;  %v515_v4 = vld [vmem:[#allocation5 + $0x20] sm:$0xff]   ;;  %v516_v5 = vld [vmem:[#allocation5 + $0x18] sm:$0xff]   ;;  %s626_s21 = smov [#allocation8]  }
  0x27   :  { %482 = vmatprep.subr.bf16.mxu1 %v624_v0  ;;  %498 = vmatprep.mubr.msk.bf16.mxu1 %vm625_vm0, %v624_v0  ;;  %v517_v6 = vld [vmem:[#allocation5 + $0x10] sm:$0xff]   ;;  %v518_v7 = vld [vmem:[#allocation5 + $0x8] sm:$0xff]   ;;  %v519_v8 = vld [vmem:[#allocation5] sm:$0xff]   ;;  %s410_s22 = sshll.u32 %s626_s21, 4  ;;  %s411_s22 = int_to_ptr.vmem [resolvable:$true] %s410_s22 }
  0x28   :  { %463 = vmatpush3.bf16.msra.mxu0 %v512_v1  ;;  %v520_v9 = vld [vmem:[#allocation2] sm:$0xff]   ;;  %v522_v11 = vld [vmem:[#allocation7 + $0x30] sm:$0xff]   ;;  %v523_v12 = vld [vmem:[#allocation7 + $0x28] sm:$0xff]   ;;  %p598_p2 = scmp.lt.s32.totalorder %s411_s22, %s411_s22 }
  0x29   :  { %464 = vmatprep.subr.bf16.mxu0 %v624_v0  ;;  %v521_v10 = vld [vmem:[#allocation7 + $0x38] sm:$0xff]   ;;  %v524_v13 = vld [vmem:[#allocation7 + $0x20] sm:$0xff]   ;;  %v526_v15 = vld [vmem:[#allocation7 + $0x10] sm:$0xff]  }
  0x2a   :  { %483 = vmatpush3.bf16.msra.mxu1 %v521_v10  ;;  %v525_v14 = vld [vmem:[#allocation7 + $0x18] sm:$0xff]   ;;  %v527_v16 = vld [vmem:[#allocation7 + $0x8] sm:$0xff]   ;;  %v528_v17 = vld [vmem:[#allocation7] sm:$0xff]  }
  0x2b   :  { %484 = vmatprep.subr.bf16.mxu1 %v624_v0  ;;  %v432_v47 = vld [vmem:[%s695_s2] ss:$0 sm:$0xff] }
  0x2c   :  { %465 = vmatpush3.bf16.msra.mxu0 %v513_v2  ;;  %v433_v50 = vld [vmem:[%s696_s3] ss:$0 sm:$0xff] }
  0x2d   :  { %466 = vmatprep.subr.bf16.mxu0 %v624_v0 }
  0x2e   :  { %485 = vmatpush3.bf16.msra.mxu1 %v522_v11 }
  0x2f   :  { %486 = vmatprep.subr.bf16.mxu1 %v624_v0 }
  0x30   :  { %467 = vmatpush3.bf16.msra.mxu0 %v514_v3 }
  0x31   :  { %468 = vmatprep.subr.bf16.mxu0 %v624_v0 }
  0x32   :  { %487 = vmatpush3.bf16.msra.mxu1 %v523_v12 }
  0x33   :  { %488 = vmatprep.subr.bf16.mxu1 %v624_v0 }
  0x34   :  { %469 = vmatpush3.bf16.msra.mxu0 %v515_v4 }
  0x35   :  { %470 = vmatprep.subr.bf16.mxu0 %v624_v0 }
  0x36   :  { %489 = vmatpush3.bf16.msra.mxu1 %v524_v13 }
  0x37   :  { %490 = vmatprep.subr.bf16.mxu1 %v624_v0 }
  0x38   :  { %471 = vmatpush3.bf16.msra.mxu0 %v516_v5 }
  0x39   :  { %472 = vmatprep.subr.bf16.mxu0 %v624_v0 }
  0x3a   :  { %491 = vmatpush3.bf16.msra.mxu1 %v525_v14 }
  0x3b   :  { %492 = vmatprep.subr.bf16.mxu1 %v624_v0 }
  0x3c   :  { %473 = vmatpush3.bf16.msra.mxu0 %v517_v6 }
  0x3d   :  { %474 = vmatprep.subr.bf16.mxu0 %v624_v0 }
  0x3e   :  { %493 = vmatpush3.bf16.msra.mxu1 %v526_v15 }
  0x3f   :  { %494 = vmatprep.subr.bf16.mxu1 %v624_v0 }
  0x40   :  { %475 = vmatpush3.bf16.msra.mxu0 %v518_v7 }
  0x41   :  { %476 = vmatprep.subr.bf16.mxu0 %v624_v0 }
  0x42   :  { %495 = vmatpush3.bf16.msra.mxu1 %v527_v16 }
  0x43   :  { %496 = vmatprep.subr.bf16.mxu1 %v624_v0 }
  0x44   :  { %477 = vmatpush3.bf16.msra.mxu0 %v519_v8 }
  0x46   :  { %497 = vmatpush3.bf16.msra.mxu1 %v528_v17 }
  0x47   :  { %479 = vmatmul.mubr.bf16.vlgmr.msra.gmra.mxu0 %v520_v9 }
 0x107   :  { %v184_v18 = vpop.f32.mrf.mxu0 }
 0x108   :  { %v198_v21 = vmul.f32 %v184_v18, %v184_v18 }
 0x109   :  { %v480_v19 = vpop.f32.mrf.mxu0 }
 0x10b   :  { %v187_v20 = vpop.f32.mrf.mxu0 }
 0x10c   :  { %v191_v22 = vadd.f32 %v187_v20, %v184_v18  ;;  %v199_v23 = vmul.f32 %v187_v20, %v187_v20 }
 0x10d   :  { %v481_v24 = vpop.f32.mrf.mxu0 }
 0x10e   :  { %v192_v25 = vrot.slane %v191_v22, 4  ;;  %v200_v26 = vadd.f32 %v199_v23, %v198_v21 }
 0x110   :  { %v193_v27 = vadd.f32 %v192_v25, %v191_v22  ;;  %v201_v28 = vrot.slane %v200_v26, 4 }
 0x112   :  { %v194_v29 = vrot.slane %v193_v27, 2  ;;  %v202_v30 = vadd.f32 %v201_v28, %v200_v26  ;;  %v442_v26 = vld [vmem:[%s698_s5] ss:$0 sm:$0xff]  ;;  %s593_s5 = scalar_lea.vmem %s411_s22, 256 }
 0x113   :  { %p594_p1 = scmp.ne.s32.totalorder %s411_s22, %s593_s5  ;;  %p599_p3 = scmp.lt.s32.totalorder %s593_s5, %s593_s5 }
 0x114   :  { %v195_v31 = vadd.f32 %v194_v29, %v193_v27  ;;  %v203_v32 = vrot.slane %v202_v30, 2  ;;  %v443_v29 = vld [vmem:[%s699_s6] ss:$0 sm:$0xff] }
 0x115   :  { %p600_p4 = por %p599_p3, %p598_p2 }
 0x116   :  { %v196_v33 = vrot.slane %v195_v31, 1  ;;  %v204_v34 = vadd.f32 %v203_v32, %v202_v30 }
 0x117   :  { %p601_p5 = pnand %p600_p4, %p594_p1 }
 0x118   :  { %v197_v35 = vadd.f32 %v196_v33, %v195_v31  ;;  %v205_v36 = vrot.slane %v204_v34, 1 }
 0x11a   :  { %v206_v37 = vadd.f32 %v205_v36, %v204_v34  ;;  %v207_v38 = vmul.f32 0.125, %v197_v35 }
 0x11c   :  { %v208_v39 = vmul.f32 0.125, %v206_v37  ;;  %v209_v40 = vmul.f32 %v207_v38, %v207_v38  ;;  %v212_v44 = vsub.f32 %v184_v18, %v207_v38  ;;  %v213_v45 = vsub.f32 %v187_v20, %v207_v38 }
 0x11e   :  { %v210_v41 = vsub.f32 %v208_v39, %v209_v40 }
 0x120   :  { %v211_v42 = vmax.f32 %v210_v41, 0.0 }
 0x122   :  { %v214_v43 = vadd.f32 1e-05, %v211_v42 }
 0x124   :  { %529 = vrsqrt.f32 %v214_v43 }
 0x131   :  { %v530_v46 = vpop.eup %529 }
 0x132   :  { %v216_v48 = vmul.f32 %v530_v46, %v212_v44  ;;  %v217_v49 = vmul.f32 %v530_v46, %v213_v45 }
 0x134   :  { %v225_v51 = vmul.f32 %v432_v47, %v216_v48  ;;  %v226_v52 = vmul.f32 %v432_v47, %v217_v49 }
 0x136   :  { %v235_v53 = vadd.f32 %v433_v50, %v226_v52  ;;  %v234_v54 = vadd.f32 %v433_v50, %v225_v51 }
 0x138   :  { %vm237_vm1 = vcmp.ge.f32.partialorder %v235_v53, 0.0  ;;  %v238_v55 = vmul.f32 0.01, %v234_v54  ;;  %v239_v56 = vmul.f32 0.01, %v235_v53  ;;  %vm236_vm2 = vcmp.ge.f32.partialorder %v234_v54, 0.0 }
 0x13a   :  { %v241_v57 = vsel %vm237_vm1, %v235_v53, %v239_v56  ;;  %v240_v59 = vsel %vm236_vm2, %v234_v54, %v238_v55 }
 0x13b   :  { %v243_v58 = vmul.f32 0.0, %v241_v57 }
 0x13d   :  { %v244_v60 = vpack.c.bf16 %v243_v58, %v240_v59 }
 0x13f   :  { %499 = vmatmul.mubr.bf16.vlgmr.msra.gmra.mxu1 %v244_v60 }
 0x1ff   :  { %v343_v61 = vpop.f32.mrf.mxu1 }
 0x200   :  { %v357_v0 = vmul.f32 %v343_v61, %v343_v61 }
 0x201   :  { %v500_v62 = vpop.f32.mrf.mxu1 }
 0x203   :  { %v346_v63 = vpop.f32.mrf.mxu1 }
 0x204   :  { %v350_v1 = vadd.f32 %v346_v63, %v343_v61  ;;  %v358_v2 = vmul.f32 %v346_v63, %v346_v63 }
 0x205   :  { %v501_v3 = vpop.f32.mrf.mxu1 }
 0x206   :  { %v351_v4 = vrot.slane %v350_v1, 4  ;;  %v359_v5 = vadd.f32 %v358_v2, %v357_v0 }
 0x208   :  { %v352_v6 = vadd.f32 %v351_v4, %v350_v1  ;;  %v360_v7 = vrot.slane %v359_v5, 4 }
 0x20a   :  { %v353_v8 = vrot.slane %v352_v6, 2  ;;  %v361_v9 = vadd.f32 %v360_v7, %v359_v5 }
 0x20c   :  { %v354_v10 = vadd.f32 %v353_v8, %v352_v6  ;;  %v362_v11 = vrot.slane %v361_v9, 2 }
 0x20e   :  { %v355_v12 = vrot.slane %v354_v10, 1  ;;  %v363_v13 = vadd.f32 %v362_v11, %v361_v9 }
 0x210   :  { %v356_v14 = vadd.f32 %v355_v12, %v354_v10  ;;  %v364_v15 = vrot.slane %v363_v13, 1 }
 0x212   :  { %v365_v16 = vadd.f32 %v364_v15, %v363_v13  ;;  %v366_v17 = vmul.f32 0.125, %v356_v14 }
 0x214   :  { %v367_v18 = vmul.f32 0.125, %v365_v16  ;;  %v368_v19 = vmul.f32 %v366_v17, %v366_v17  ;;  %v371_v23 = vsub.f32 %v343_v61, %v366_v17  ;;  %v372_v24 = vsub.f32 %v346_v63, %v366_v17 }
 0x216   :  { %v369_v20 = vsub.f32 %v367_v18, %v368_v19 }
 0x218   :  { %v370_v21 = vmax.f32 %v369_v20, 0.0 }
 0x21a   :  { %v373_v22 = vadd.f32 1e-05, %v370_v21 }
 0x21c   :  { %531 = vrsqrt.f32 %v373_v22 }
 0x229   :  { %v532_v25 = vpop.eup %531 }
 0x22a   :  { %v375_v27 = vmul.f32 %v532_v25, %v371_v23  ;;  %v376_v28 = vmul.f32 %v532_v25, %v372_v24 }
 0x22c   :  { %v384_v30 = vmul.f32 %v442_v26, %v375_v27  ;;  %v385_v31 = vmul.f32 %v442_v26, %v376_v28 }
 0x22e   :  { %v393_v32 = vadd.f32 %v443_v29, %v384_v30  ;;  %v394_v33 = vadd.f32 %v443_v29, %v385_v31 }
 0x230   :  { %v398_v34 = vmul.f32 0.01, %v394_v33  ;;  %vm395_vm3 = vcmp.ge.f32.partialorder %v393_v32, 0.0  ;;  %vm396_vm4 = vcmp.ge.f32.partialorder %v394_v33, 0.0  ;;  %v397_v35 = vmul.f32 0.01, %v393_v32 }
 0x232   :  { %v399_v36 = vsel %vm395_vm3, %v393_v32, %v397_v35  ;;  %v400_v37 = vsel %vm396_vm4, %v394_v33, %v398_v34 }
 0x233   :  { %v402_v38 = vmul.f32 0.0, %v400_v37  ;;  %403 = vst [vmem:[#allocation8] sm:$0xff] %v399_v36 }
 0x235   :  { %404 = vst [vmem:[#allocation8 + $0x8] sm:$0xff] %v402_v38 }
 0x236   :  { %604 = shalt.err (!%p601_p5)
}
 0x237   :  { %s627_s6 = smov 128   ;;  %s628_s23 = smov 8  }
 0x238   :  { %416 = dma.vmem_to_hbm [thread:$0]  %s411_s22, 256, %s700_s7, [#allocation4], %s627_s6, %s627_s6, %s628_s23  }
 0x239   :  { %617 = dma.done.wait [#allocation4], 256  }
 0x23a   :  { %618 = vsyncadd [#allocation4], 4294967040 }
 0x23b   :  { %420 = vsyncpa [#allocation3], 1 }
 0x23c   :  { %421 = vsyncpa [#allocation6], 1 }
 0x23d   :  { %422 = vsyncpa [#allocation4], 1 }

</bundles_post_ra>
